<compile_context>
chip_gen: v6e
topology: v6e:2x2x1
jax: 0.10.0
libtpu: 0.0.40
codegen_flags: <defaults>
</compile_context>

<pallas_src>
import functools

import jax
import jax.numpy as jnp
from jax.experimental import pallas as pl
from jax.experimental.pallas import tpu as pltpu

EPS = 1e-6
_LANES = 128
_SUBLANES = 8


def _group4_sum(x):
    """Sum over each aligned group of 4 lanes; valid at lanes where lane%4==0.

    pltpu.roll keeps the rotations on the XLU (vector-extended slot) rather
    than the VALU.  roll(x, L-1)[:, j] == x[:, j+1]; boxes (groups of 4 lanes)
    never straddle the 128-lane row boundary (128 % 4 == 0), so wraparound
    only pollutes lanes that are not selected afterwards.
    """
    L = x.shape[-1]
    y = x + pltpu.roll(x, L - 1, axis=1)      # y[:, j] = x[:, j] + x[:, j+1]
    return y + pltpu.roll(y, L - 2, axis=1)   # z[:, 4k] = box sum 4k..4k+3


def _cross_iou_kernel(pred_ref, target_ref, mask_ref,
                      loss_out_ref, mask_out_ref,
                      loss_acc_ref, mask_acc_ref,
                      *, n_valid_rows, steps_per_core):
    c = pl.program_id(0)           # core-split index ("parallel")
    s = pl.program_id(1)           # step within this core ("arbitrary")

    @pl.when(s == 0)
    def _():
        loss_acc_ref[...] = jnp.zeros_like(loss_acc_ref)
        mask_acc_ref[...] = jnp.zeros_like(mask_acc_ref)

    # Upcast in-kernel (hidden under the DMA); inputs may be bf16/f16/f32.
    p = pred_ref[...].astype(jnp.float32)
    t = target_ref[...].astype(jnp.float32)
    m = mask_ref[...].astype(jnp.float32)
    tr, L = p.shape

    l_min = jnp.minimum(p, t)
    l_max = jnp.maximum(jnp.maximum(p, t), EPS)   # per-element clamp(min=eps)

    min_sum = _group4_sum(l_min)                  # box sums at lanes 4k
    max_sum = _group4_sum(l_max)                  # >= 4*eps at valid lanes
    # Exact divide keeps the 1e-5 tolerance vs the reference; swap to
    # min_sum * pl.reciprocal(max_sum, approx=True) if ~2^-12 rel-err is OK.
    loss_elem = (1.0 - min_sum / max_sum) * m     # only lanes 4k are kept

    lane_ids = jax.lax.broadcasted_iota(jnp.int32, (tr, L), 1)
    lane_valid = (lane_ids & 3) == 0

    blk = c * steps_per_core + s                  # raw (unclamped) block index
    ragged = (blk + 1) * tr > n_valid_rows        # block has out-of-range rows

    def accumulate(valid):
        # where-select (not multiply) so NaN/Inf from out-of-range garbage
        # rows can never reach either accumulator.  Fold the (tr,128) tile
        # into the (8,128) running accumulator with a free (tr//8,8,128)
        # view + sublane-aligned vreg adds.
        loss_sel = jnp.where(valid, loss_elem, 0.0)
        mask_sel = jnp.where(valid, m, 0.0)
        loss_acc_ref[...] += jnp.sum(
            loss_sel.reshape(tr // _SUBLANES, _SUBLANES, L), axis=0)
        mask_acc_ref[...] += jnp.sum(
            mask_sel.reshape(tr // _SUBLANES, _SUBLANES, L), axis=0)

    @pl.when(jnp.logical_not(ragged))
    def _():
        accumulate(lane_valid)

    @pl.when(ragged)
    def _():
        # Row mask is applied to EVERY block containing out-of-range rows,
        # including clamped duplicate blocks (their raw row ids are all
        # >= n_valid_rows, so they contribute nothing -> no double counting).
        row_ids = blk * tr + jax.lax.broadcasted_iota(jnp.int32, (tr, L), 0)
        accumulate(jnp.logical_and(lane_valid, row_ids < n_valid_rows))

    @pl.when(s == pl.num_programs(1) - 1)
    def _():
        loss_out_ref[...] = loss_acc_ref[...]
        mask_out_ref[...] = mask_acc_ref[...]


def _default_core_splits():
    # Only v7x has two TensorCores per chip; on single-TC v5e/v6e a 2-way
    # split just duplicates one clamped tile of HBM traffic for no payoff.
    # TODO(synk): on v7x, verify via xprof that the "parallel" axis really
    # shards across both TCs; if not, switch to pltpu.CORE_PARALLEL /
    # pl.core_map over a tensorcore mesh.
    try:
        kind = jax.devices()[0].device_kind.lower()
    except Exception:
        return 1
    return 2 if "v7" in kind else 1


@functools.partial(jax.jit, static_argnames=("block_rows", "core_splits"))
def cross_iou_loss(pred, target, mask, *, block_rows=4096, core_splits=None):
    if pred.shape != target.shape or pred.shape != mask.shape:
        raise ValueError("pred, target and mask must have the same shape")
    n_elems = pred.size
    if n_elems % 4 != 0:
        raise ValueError("total element count must be divisible by 4")

    flat_p = pred.reshape(-1)
    flat_t = target.reshape(-1)
    flat_m = mask.reshape(-1)

    # Free row-major reshape to a lane-dense (rows, 128) slab; rows are padded
    # to a multiple of 8 so the in-kernel (tr//8, 8, 128) fold is exact.
    row_elems = _LANES * _SUBLANES
    pad = (-n_elems) % row_elems
    if pad:
        # TODO(synk): padding costs one extra HBM pass; only hit when
        # numel % 1024 != 0.  Padded boxes have mask == 0 so contribute 0.
        flat_p = jnp.pad(flat_p, (0, pad))
        flat_t = jnp.pad(flat_t, (0, pad))
        flat_m = jnp.pad(flat_m, (0, pad))
    n_rows = (n_elems + pad) // _LANES

    p2 = flat_p.reshape(n_rows, _LANES)
    t2 = flat_t.reshape(n_rows, _LANES)
    m2 = flat_m.reshape(n_rows, _LANES)

    # Block: whole array if small, otherwise `block_rows` rows (multiple of 8).
    if n_rows <= block_rows:
        tr = n_rows
    else:
        tr = max(_SUBLANES, (block_rows // _SUBLANES) * _SUBLANES)
    n_blocks = pl.cdiv(n_rows, tr)

    if core_splits is None:
        core_splits = _default_core_splits()
    nc = max(1, min(core_splits, n_blocks))
    steps = pl.cdiv(n_blocks, nc)

    def in_map(c, s):
        # Clamp so trailing duplicate blocks (from the core split / ragged
        # grid) stay in range; their contributions are masked in-kernel.
        return (jnp.minimum(c * steps + s, n_blocks - 1), 0)

    kernel = functools.partial(
        _cross_iou_kernel, n_valid_rows=n_rows, steps_per_core=steps)

    loss_part, mask_part = pl.pallas_call(
        kernel,
        out_shape=(
            jax.ShapeDtypeStruct((nc * _SUBLANES, _LANES), jnp.float32),
            jax.ShapeDtypeStruct((nc * _SUBLANES, _LANES), jnp.float32),
        ),
        grid=(nc, steps),
        in_specs=[
            pl.BlockSpec((tr, _LANES), in_map),
            pl.BlockSpec((tr, _LANES), in_map),
            pl.BlockSpec((tr, _LANES), in_map),
        ],
        out_specs=(
            pl.BlockSpec((_SUBLANES, _LANES), lambda c, s: (c, 0)),
            pl.BlockSpec((_SUBLANES, _LANES), lambda c, s: (c, 0)),
        ),
        scratch_shapes=[
            pltpu.VMEM((_SUBLANES, _LANES), jnp.float32),
            pltpu.VMEM((_SUBLANES, _LANES), jnp.float32),
        ],
        compiler_params=pltpu.CompilerParams(
            dimension_semantics=("parallel", "arbitrary"),
            vmem_limit_bytes=32 * 1024 * 1024,
        ),
    )(p2, t2, m2)

    # TODO(synk): upstream producers could pass a compact per-box mask
    # (numel/4 elements) to cut total HBM traffic by ~17%; do NOT add a
    # wrapper-side strided slice here (it would cost an extra HBM pass).
    loss_sum = jnp.sum(loss_part)
    mask_sum = jnp.sum(mask_part)
    return loss_sum / (mask_sum + EPS)


def cross_iou_loss_ref(pred, target, mask):
    """Pure-JAX reference mirroring the PyTorch module."""
    B = pred.shape[0]
    pred_r = pred.reshape(B, -1, 4).astype(jnp.float32)
    target_r = target.reshape(B, -1, 4).astype(jnp.float32)
    mask_r = mask.reshape(B, -1, 4).astype(jnp.float32)
    total = jnp.stack([pred_r, target_r], -1)
    l_max = jnp.maximum(total.max(axis=-1), EPS)
    l_min = total.min(axis=-1)
    overlaps = l_min.sum(axis=-1) / l_max.sum(axis=-1)
    loss = 1.0 - overlaps
    m0 = mask_r[:, :, 0]
    return (loss * m0).sum() / (m0.sum() + EPS)


if __name__ == "__main__":
    key = jax.random.PRNGKey(0)
    k1, k2, k3 = jax.random.split(key, 3)

    # Small NCHW-ish inputs: (B, C, H, W) with C*H*W divisible by 4.
    shape = (2, 4, 16, 16)
    pred = jax.random.uniform(k1, shape, dtype=jnp.float32)
    target = jax.random.uniform(k2, shape, dtype=jnp.float32)
    mask = (jax.random.uniform(k3, shape) > 0.3).astype(jnp.float32)

    out = jax.block_until_ready(cross_iou_loss(pred, target, mask))
    ref = cross_iou_loss_ref(pred, target, mask)
    assert jnp.allclose(out, ref, rtol=1e-5, atol=1e-5), (out, ref)

    print("KERNEL_OK")
</pallas_src>

<mosaic_0001>
module attributes {stable_mosaic.version = 11 : i64} {
  func.func @_cross_iou_kernel(%arg0: i32, %arg1: i32, %arg2: memref<16x128xf32, #tpu.memory_space<vmem>>, %arg3: memref<16x128xf32, #tpu.memory_space<vmem>>, %arg4: memref<16x128xf32, #tpu.memory_space<vmem>>, %arg5: memref<8x128xf32, #tpu.memory_space<vmem>>, %arg6: memref<8x128xf32, #tpu.memory_space<vmem>>, %arg7: memref<8x128xf32, #tpu.memory_space<vmem>>, %arg8: memref<8x128xf32, #tpu.memory_space<vmem>>) attributes {dimension_semantics = [#tpu.dimension_semantics<parallel>, #tpu.dimension_semantics<arbitrary>], iteration_bounds = array<i64: 1, 1>, scalar_prefetch = 0 : i64, scratch_operands = 2 : i64, tpu.core_type = #tpu.core_type<tc>, window_params = [{transform_indices = @transform_0, window_bounds = array<i64: 16, 128>}, {transform_indices = @transform_1, window_bounds = array<i64: 16, 128>}, {transform_indices = @transform_2, window_bounds = array<i64: 16, 128>}, {transform_indices = @transform_3, window_bounds = array<i64: 8, 128>}, {transform_indices = @transform_4, window_bounds = array<i64: 8, 128>}]} {
    %c0_i32 = arith.constant 0 : i32
    %0 = arith.cmpi eq, %arg1, %c0_i32 : i32
    %1 = arith.extui %0 : i1 to i32
    %c0_i32_0 = arith.constant 0 : i32
    %2 = arith.cmpi ne, %1, %c0_i32_0 : i32
    scf.if %2 {
      %cst_16 = arith.constant 0.000000e+00 : f32
      %40 = vector.broadcast %cst_16 : f32 to vector<8x128xf32>
      %c0_17 = arith.constant 0 : index
      %c0_18 = arith.constant 0 : index
      %41 = vector.load %arg7[%c0_17, %c0_18] : memref<8x128xf32, #tpu.memory_space<vmem>>, vector<8x128xf32>
      tpu.vector_store %arg7[%c0_17, %c0_18], %40 {strides = array<i32>} : memref<8x128xf32, #tpu.memory_space<vmem>>, vector<8x128xf32>,
      %cst_19 = arith.constant 0.000000e+00 : f32
      %42 = vector.broadcast %cst_19 : f32 to vector<8x128xf32>
      %c0_20 = arith.constant 0 : index
      %c0_21 = arith.constant 0 : index
      %43 = vector.load %arg8[%c0_20, %c0_21] : memref<8x128xf32, #tpu.memory_space<vmem>>, vector<8x128xf32>
      tpu.vector_store %arg8[%c0_20, %c0_21], %42 {strides = array<i32>} : memref<8x128xf32, #tpu.memory_space<vmem>>, vector<8x128xf32>,
    } else {
    }
    %c0 = arith.constant 0 : index
    %c0_1 = arith.constant 0 : index
    %3 = vector.load %arg2[%c0, %c0_1] : memref<16x128xf32, #tpu.memory_space<vmem>>, vector<16x128xf32>
    %c0_2 = arith.constant 0 : index
    %c0_3 = arith.constant 0 : index
    %4 = vector.load %arg3[%c0_2, %c0_3] : memref<16x128xf32, #tpu.memory_space<vmem>>, vector<16x128xf32>
    %c0_4 = arith.constant 0 : index
    %c0_5 = arith.constant 0 : index
    %5 = vector.load %arg4[%c0_4, %c0_5] : memref<16x128xf32, #tpu.memory_space<vmem>>, vector<16x128xf32>
    %6 = arith.minimumf %3, %4 : vector<16x128xf32>
    %7 = arith.maximumf %3, %4 : vector<16x128xf32>
    %cst = arith.constant 9.99999997E-7 : f32
    %8 = vector.broadcast %cst : f32 to vector<16x128xf32>
    %9 = arith.maximumf %7, %8 : vector<16x128xf32>
    %c127_i32 = arith.constant 127 : i32
    %10 = tpu.dynamic_rotate %6 by %c127_i32 dim 1 : vector<16x128xf32>, i32 -> vector<16x128xf32>
    %11 = arith.addf %6, %10 : vector<16x128xf32>
    %c126_i32 = arith.constant 126 : i32
    %12 = tpu.dynamic_rotate %11 by %c126_i32 dim 1 : vector<16x128xf32>, i32 -> vector<16x128xf32>
    %13 = arith.addf %11, %12 : vector<16x128xf32>
    %c127_i32_6 = arith.constant 127 : i32
    %14 = tpu.dynamic_rotate %9 by %c127_i32_6 dim 1 : vector<16x128xf32>, i32 -> vector<16x128xf32>
    %15 = arith.addf %9, %14 : vector<16x128xf32>
    %c126_i32_7 = arith.constant 126 : i32
    %16 = tpu.dynamic_rotate %15 by %c126_i32_7 dim 1 : vector<16x128xf32>, i32 -> vector<16x128xf32>
    %17 = arith.addf %15, %16 : vector<16x128xf32>
    %18 = arith.divf %13, %17 : vector<16x128xf32>
    %cst_8 = arith.constant 1.000000e+00 : f32
    %19 = vector.broadcast %cst_8 : f32 to vector<16x128xf32>
    %20 = arith.subf %19, %18 : vector<16x128xf32>
    %21 = arith.mulf %20, %5 : vector<16x128xf32>
    %22 = tpu.iota {dimensions = array<i32: 1>} : vector<16x128xi32>
    %c3_i32 = arith.constant 3 : i32
    %23 = vector.broadcast %c3_i32 : i32 to vector<16x128xi32>
    %24 = arith.andi %22, %23 : vector<16x128xi32>
    %c0_i32_9 = arith.constant 0 : i32
    %25 = vector.broadcast %c0_i32_9 : i32 to vector<16x128xi32>
    %26 = arith.cmpi eq, %24, %25 : vector<16x128xi32>
    %c1_i32 = arith.constant 1 : i32
    %27 = arith.muli %arg0, %c1_i32 : i32
    %28 = arith.addi %27, %arg1 : i32
    %c1_i32_10 = arith.constant 1 : i32
    %29 = arith.addi %28, %c1_i32_10 : i32
    %c16_i32 = arith.constant 16 : i32
    %30 = arith.muli %29, %c16_i32 : i32
    %c16_i32_11 = arith.constant 16 : i32
    %31 = arith.cmpi sgt, %30, %c16_i32_11 : i32
    %true = arith.constant true
    %32 = arith.xori %31, %true : i1
    %33 = arith.extui %32 : i1 to i32
    %c0_i32_12 = arith.constant 0 : i32
    %34 = arith.cmpi ne, %33, %c0_i32_12 : i32
    scf.if %34 {
      %cst_16 = arith.constant 0.000000e+00 : f32
      %40 = vector.broadcast %cst_16 : f32 to vector<16x128xf32>
      %41 = arith.select %26, %21, %40 : vector<16x128xi1>, vector<16x128xf32>
      %cst_17 = arith.constant 0.000000e+00 : f32
      %42 = vector.broadcast %cst_17 : f32 to vector<16x128xf32>
      %43 = arith.select %26, %5, %42 : vector<16x128xi1>, vector<16x128xf32>
      %c0_18 = arith.constant 0 : index
      %c0_19 = arith.constant 0 : index
      %44 = vector.load %arg7[%c0_18, %c0_19] : memref<8x128xf32, #tpu.memory_space<vmem>>, vector<8x128xf32>
      %45 = vector.shape_cast %41 : vector<16x128xf32> to vector<2x8x128xf32>
      %cst_20 = arith.constant dense<0.000000e+00> : vector<8x128xf32>
      %46 = vector.multi_reduction <add>, %45, %cst_20 [0] : vector<2x8x128xf32> to vector<8x128xf32>
      %47 = arith.addf %44, %46 : vector<8x128xf32>
      %c0_21 = arith.constant 0 : index
      %c0_22 = arith.constant 0 : index
      %48 = vector.load %arg7[%c0_21, %c0_22] : memref<8x128xf32, #tpu.memory_space<vmem>>, vector<8x128xf32>
      tpu.vector_store %arg7[%c0_21, %c0_22], %47 {strides = array<i32>} : memref<8x128xf32, #tpu.memory_space<vmem>>, vector<8x128xf32>,
      %c0_23 = arith.constant 0 : index
      %c0_24 = arith.constant 0 : index
      %49 = vector.load %arg8[%c0_23, %c0_24] : memref<8x128xf32, #tpu.memory_space<vmem>>, vector<8x128xf32>
      %50 = vector.shape_cast %43 : vector<16x128xf32> to vector<2x8x128xf32>
      %cst_25 = arith.constant dense<0.000000e+00> : vector<8x128xf32>
      %51 = vector.multi_reduction <add>, %50, %cst_25 [0] : vector<2x8x128xf32> to vector<8x128xf32>
      %52 = arith.addf %49, %51 : vector<8x128xf32>
      %c0_26 = arith.constant 0 : index
      %c0_27 = arith.constant 0 : index
      %53 = vector.load %arg8[%c0_26, %c0_27] : memref<8x128xf32, #tpu.memory_space<vmem>>, vector<8x128xf32>
      tpu.vector_store %arg8[%c0_26, %c0_27], %52 {strides = array<i32>} : memref<8x128xf32, #tpu.memory_space<vmem>>, vector<8x128xf32>,
    } else {
    }
    %35 = arith.extui %31 : i1 to i32
    %c0_i32_13 = arith.constant 0 : i32
    %36 = arith.cmpi ne, %35, %c0_i32_13 : i32
    scf.if %36 {
      %c16_i32_16 = arith.constant 16 : i32
      %40 = arith.muli %28, %c16_i32_16 : i32
      %41 = tpu.iota {dimensions = array<i32: 0>} : vector<16x128xi32>
      %42 = vector.broadcast %40 : i32 to vector<16x128xi32>
      %43 = arith.addi %42, %41 : vector<16x128xi32>
      %c16_i32_17 = arith.constant 16 : i32
      %44 = vector.broadcast %c16_i32_17 : i32 to vector<16x128xi32>
      %45 = arith.cmpi slt, %43, %44 : vector<16x128xi32>
      %46 = arith.andi %26, %45 : vector<16x128xi1>
      %cst_18 = arith.constant 0.000000e+00 : f32
      %47 = vector.broadcast %cst_18 : f32 to vector<16x128xf32>
      %48 = arith.select %46, %21, %47 : vector<16x128xi1>, vector<16x128xf32>
      %cst_19 = arith.constant 0.000000e+00 : f32
      %49 = vector.broadcast %cst_19 : f32 to vector<16x128xf32>
      %50 = arith.select %46, %5, %49 : vector<16x128xi1>, vector<16x128xf32>
      %c0_20 = arith.constant 0 : index
      %c0_21 = arith.constant 0 : index
      %51 = vector.load %arg7[%c0_20, %c0_21] : memref<8x128xf32, #tpu.memory_space<vmem>>, vector<8x128xf32>
      %52 = vector.shape_cast %48 : vector<16x128xf32> to vector<2x8x128xf32>
      %cst_22 = arith.constant dense<0.000000e+00> : vector<8x128xf32>
      %53 = vector.multi_reduction <add>, %52, %cst_22 [0] : vector<2x8x128xf32> to vector<8x128xf32>
      %54 = arith.addf %51, %53 : vector<8x128xf32>
      %c0_23 = arith.constant 0 : index
      %c0_24 = arith.constant 0 : index
      %55 = vector.load %arg7[%c0_23, %c0_24] : memref<8x128xf32, #tpu.memory_space<vmem>>, vector<8x128xf32>
      tpu.vector_store %arg7[%c0_23, %c0_24], %54 {strides = array<i32>} : memref<8x128xf32, #tpu.memory_space<vmem>>, vector<8x128xf32>,
      %c0_25 = arith.constant 0 : index
      %c0_26 = arith.constant 0 : index
      %56 = vector.load %arg8[%c0_25, %c0_26] : memref<8x128xf32, #tpu.memory_space<vmem>>, vector<8x128xf32>
      %57 = vector.shape_cast %50 : vector<16x128xf32> to vector<2x8x128xf32>
      %cst_27 = arith.constant dense<0.000000e+00> : vector<8x128xf32>
      %58 = vector.multi_reduction <add>, %57, %cst_27 [0] : vector<2x8x128xf32> to vector<8x128xf32>
      %59 = arith.addf %56, %58 : vector<8x128xf32>
      %c0_28 = arith.constant 0 : index
      %c0_29 = arith.constant 0 : index
      %60 = vector.load %arg8[%c0_28, %c0_29] : memref<8x128xf32, #tpu.memory_space<vmem>>, vector<8x128xf32>
      tpu.vector_store %arg8[%c0_28, %c0_29], %59 {strides = array<i32>} : memref<8x128xf32, #tpu.memory_space<vmem>>, vector<8x128xf32>,
    } else {
    }
    %c0_i32_14 = arith.constant 0 : i32
    %37 = arith.cmpi eq, %arg1, %c0_i32_14 : i32
    %38 = arith.extui %37 : i1 to i32
    %c0_i32_15 = arith.constant 0 : i32
    %39 = arith.cmpi ne, %38, %c0_i32_15 : i32
    scf.if %39 {
      %c0_16 = arith.constant 0 : index
      %c0_17 = arith.constant 0 : index
      %40 = vector.load %arg7[%c0_16, %c0_17] : memref<8x128xf32, #tpu.memory_space<vmem>>, vector<8x128xf32>
      %c0_18 = arith.constant 0 : index
      %c0_19 = arith.constant 0 : index
      %41 = vector.load %arg5[%c0_18, %c0_19] : memref<8x128xf32, #tpu.memory_space<vmem>>, vector<8x128xf32>
      tpu.vector_store %arg5[%c0_18, %c0_19], %40 {strides = array<i32>} : memref<8x128xf32, #tpu.memory_space<vmem>>, vector<8x128xf32>,
      %c0_20 = arith.constant 0 : index
      %c0_21 = arith.constant 0 : index
      %42 = vector.load %arg8[%c0_20, %c0_21] : memref<8x128xf32, #tpu.memory_space<vmem>>, vector<8x128xf32>
      %c0_22 = arith.constant 0 : index
      %c0_23 = arith.constant 0 : index
      %43 = vector.load %arg6[%c0_22, %c0_23] : memref<8x128xf32, #tpu.memory_space<vmem>>, vector<8x128xf32>
      tpu.vector_store %arg6[%c0_22, %c0_23], %42 {strides = array<i32>} : memref<8x128xf32, #tpu.memory_space<vmem>>, vector<8x128xf32>,
    } else {
    }
    return
  }
  func.func @transform_0(%arg0: i32, %arg1: i32) -> (i32, i32) {
    %c1_i32 = arith.constant 1 : i32
    %0 = arith.muli %arg0, %c1_i32 : i32
    %1 = arith.addi %0, %arg1 : i32
    %c0_i32 = arith.constant 0 : i32
    %2 = arith.minsi %1, %c0_i32 : i32
    %c0_i32_0 = arith.constant 0 : i32
    %c0_i32_1 = arith.constant 0 : i32
    return %2, %c0_i32_0 : i32, i32
  }
  func.func @transform_1(%arg0: i32, %arg1: i32) -> (i32, i32) {
    %c1_i32 = arith.constant 1 : i32
    %0 = arith.muli %arg0, %c1_i32 : i32
    %1 = arith.addi %0, %arg1 : i32
    %c0_i32 = arith.constant 0 : i32
    %2 = arith.minsi %1, %c0_i32 : i32
    %c0_i32_0 = arith.constant 0 : i32
    %c0_i32_1 = arith.constant 0 : i32
    return %2, %c0_i32_0 : i32, i32
  }
  func.func @transform_2(%arg0: i32, %arg1: i32) -> (i32, i32) {
    %c1_i32 = arith.constant 1 : i32
    %0 = arith.muli %arg0, %c1_i32 : i32
    %1 = arith.addi %0, %arg1 : i32
    %c0_i32 = arith.constant 0 : i32
    %2 = arith.minsi %1, %c0_i32 : i32
    %c0_i32_0 = arith.constant 0 : i32
    %c0_i32_1 = arith.constant 0 : i32
    return %2, %c0_i32_0 : i32, i32
  }
  func.func @transform_3(%arg0: i32, %arg1: i32) -> (i32, i32) {
    %c0_i32 = arith.constant 0 : i32
    %c0_i32_0 = arith.constant 0 : i32
    return %arg0, %c0_i32 : i32, i32
  }
  func.func @transform_4(%arg0: i32, %arg1: i32) -> (i32, i32) {
    %c0_i32 = arith.constant 0 : i32
    %c0_i32_0 = arith.constant 0 : i32
    return %arg0, %c0_i32 : i32, i32
  }
}

</mosaic_0001>

<bundles_post_ra>
// kernel: cross_iou_loss.1
= control target key start
LH: loop header
LB: loop body
LE: loop exit
PB: predicated region body
PF: predicated region fallthrough
CT: control target
= control target key end

     0   :  { %s251_s23 = smov 127   ;;  %v162_v11 = vlaneseq  ;;  %s314_s0 = inlined_call_operand.vmem [shape: f32[16,128], index: 0, kind: input, shape index: {}]   ;;  %s315_s1 = inlined_call_operand.vmem [shape: f32[16,128], index: 1, kind: input, shape index: {}]   ;;  %s316_s2 = inlined_call_operand.vmem [shape: f32[16,128], index: 2, kind: input, shape index: {}]   ;;  %s317_s4 = inlined_call_operand.vmem [shape: f32[8,128], index: 4, kind: output, shape index: {1}]   ;;  %s318_s3 = inlined_call_operand.vmem [shape: f32[8,128], index: 3, kind: output, shape index: {0}]  }
   0x1   :  { %v118_v0 = vld [vmem:[%s314_s0] sm:$0xff]  ;;  %v119_v1 = vld [vmem:[%s314_s0 + $0x8] sm:$0xff]  ;;  %s252_s0 = smov 126  }
   0x2   :  { %v120_v2 = vld [vmem:[%s315_s1] sm:$0xff]  ;;  %v121_v3 = vld [vmem:[%s315_s1 + $0x8] sm:$0xff]  ;;  %v163_v14 = vand.u32 127, %v162_v11 }
   0x3   :  { %v126_v4 = vmax.f32 %v118_v0, %v120_v2  ;;  %v124_v5 = vmin.f32 %v118_v0, %v120_v2  ;;  %v127_v6 = vmax.f32 %v119_v1, %v121_v3  ;;  %v125_v8 = vmin.f32 %v119_v1, %v121_v3  ;;  %v122_v21 = vld [vmem:[%s316_s2] sm:$0xff]  ;;  %v123_v24 = vld [vmem:[%s316_s2 + $0x8] sm:$0xff] }
   0x4   :  { %v164_v19 = vand.u32 3, %v163_v14 }
   0x5   :  { %v128_v7 = vmax.f32 %v126_v4, 1e-06  ;;  %130 = vrot.lane.b32.xlu1 %v124_v5, %s251_s23  ;;  %v129_v9 = vmax.f32 %v127_v6, 1e-06 }
   0x6   :  { %vm293_vm0 = vcmp.eq.s32.totalorder %v164_v19, 0 }
   0x7   :  { %142 = vrot.lane.b32.xlu0 %v128_v7, %s251_s23  ;;  %v176_v23 = vsel %vm293_vm0, %v122_v21, 0.0  ;;  %v177_v25 = vsel %vm293_vm0, %v123_v24, 0.0 }
   0x8   :  { %v183_v26 = vadd.f32 %v177_v25, %v176_v23 }
   0x9   :  { %132 = vrot.lane.b32.xlu1 %v125_v8, %s251_s23 }
   0xa   :  { %218 = vst [vmem:[%s317_s4] sm:$0xff] %v183_v26 }
   0xb   :  { %144 = vrot.lane.b32.xlu0 %v129_v9, %s251_s23 }
  0x77   :  { %v131_v10 = vpop.permute.xlu1 %130 }
  0x78   :  { %v134_v15 = vadd.f32 %v131_v10, %v124_v5 }
  0x79   :  { %v143_v12 = vpop.permute.xlu0 %142 }
  0x7a   :  { %v146_v13 = vadd.f32 %v143_v12, %v128_v7 }
  0x7b   :  { %v133_v17 = vpop.permute.xlu1 %132 }
  0x7c   :  { %148 = vrot.lane.b32.xlu0 %v146_v13, %s252_s0  ;;  %v135_v20 = vadd.f32 %v133_v17, %v125_v8 }
  0x7d   :  { %v145_v16 = vpop.permute.xlu0 %144 }
  0x7e   :  { %v147_v18 = vadd.f32 %v145_v16, %v129_v9 }
  0x80   :  { %150 = vrot.lane.b32.xlu1 %v147_v18, %s252_s0  ;;  %136 = vrot.lane.b32.xlu0 %v134_v15, %s252_s0 }
  0x84   :  { %138 = vrot.lane.b32.xlu1 %v135_v20, %s252_s0 }
  0xee   :  { %v149_v27 = vpop.permute.xlu0 %148 }
  0xef   :  { %v152_v28 = vadd.f32 %v149_v27, %v146_v13 }
  0xf1   :  { %247 = vrcp.f32 %v152_v28 }
  0xf2   :  { %v151_v29 = vpop.permute.xlu1 %150  ;;  %v137_v31 = vpop.permute.xlu0 %136 }
  0xf3   :  { %v153_v30 = vadd.f32 %v151_v29, %v147_v18  ;;  %v140_v32 = vadd.f32 %v137_v31, %v134_v15 }
  0xf5   :  { %249 = vrcp.f32 %v153_v30 }
  0xf6   :  { %v139_v34 = vpop.permute.xlu1 %138 }
  0xf7   :  { %v141_v37 = vadd.f32 %v139_v34, %v135_v20 }
  0xfe   :  { %v248_v33 = vpop.eup %247 }
  0xff   :  { %v155_v35 = vmul.f32 %v248_v33, %v140_v32 }
 0x101   :  { %v158_v36 = vsub.f32 1.0, %v155_v35 }
 0x102   :  { %v250_v38 = vpop.eup %249 }
 0x103   :  { %v157_v39 = vmul.f32 %v250_v38, %v141_v37  ;;  %v160_v40 = vmul.f32 %v158_v36, %v122_v21 }
 0x105   :  { %v159_v41 = vsub.f32 1.0, %v157_v39  ;;  %v174_v43 = vsel %vm293_vm0, %v160_v40, 0.0 }
 0x107   :  { %v161_v42 = vmul.f32 %v159_v41, %v123_v24 }
 0x109   :  { %v175_v44 = vsel %vm293_vm0, %v161_v42, 0.0 }
 0x10a   :  { %v179_v45 = vadd.f32 %v175_v44, %v174_v43 }
 0x10c   :  { %216 = vst [vmem:[%s318_s3] sm:$0xff] %v179_v45 }

</bundles_post_ra>
